<compile_context>
chip_gen: v7x
topology: tpu7x:2x2x1
jax: 0.10.0
libtpu: 0.0.40
codegen_flags: <defaults>
</compile_context>

<pallas_src>
import functools

import jax
import jax.numpy as jnp
from jax import lax
from jax.experimental import pallas as pl
from jax.experimental.pallas import tpu as pltpu


def _up_block_kernel(act_ref, mask_ref, w1x1_ref, b1x1_ref,
                     wc1_ref, bc1_ref, wc2_ref, bc2_ref, o_ref, *, H, W):
    """One batch element per grid step; activations are (channels, H*W).

    act_ref : (1, C_in, H*W)   upsampled-x ++ skip, spatial flattened on lanes
    mask_ref: (9, 1, H*W)      0/1 border masks for the nine 3x3 taps
    w1x1_ref: (Co, C_in)       1x1 conv weight (residual branch)
    b1x1_ref: (Co, 1)          1x1 conv bias
    wc1_ref : (Cm, 9*C_in)     3x3 conv #1 weight, BN folded, tap-major columns
    bc1_ref : (Cm, 1)
    wc2_ref : (Co, 9*Cm)       3x3 conv #2 weight, BN folded
    bc2_ref : (Co, 1)
    o_ref   : (1, Co, H*W)
    """
    HW = H * W
    act = act_ref[0]                                        # (C_in, HW)

    def conv3x3_bn_relu(a, w_ref, b_ref):
        # Build the (9*C, HW) patch matrix with XLU rolls + border masks
        # (zero padding), then ONE MXU matmul with K = 9*C.
        taps = []
        t = 0
        for oy in (-1, 0, 1):
            for ox in (-1, 0, 1):
                if oy == 0 and ox == 0:
                    taps.append(a)                          # centre tap
                else:
                    shift = (-(oy * W + ox)) % HW
                    rolled = pltpu.roll(a, shift=shift, axis=1)
                    taps.append(rolled * mask_ref[t])       # zero the border
                t += 1
        patches = jnp.concatenate(taps, axis=0)             # (9*C, HW)
        out = jnp.dot(w_ref[...], patches,
                      preferred_element_type=jnp.float32)   # (C_out, HW)
        return jnp.maximum(out + b_ref[...], 0.0)           # folded-BN bias+ReLU

    h = conv3x3_bn_relu(act, wc1_ref, bc1_ref)              # conv1 + BN1 + ReLU
    h = conv3x3_bn_relu(h, wc2_ref, bc2_ref)                # conv2 + BN2 + ReLU

    # 1x1 residual branch on the concatenated input.
    res = jnp.dot(w1x1_ref[...], act,
                  preferred_element_type=jnp.float32) + b1x1_ref[...]

    o_ref[0] = (h + res).astype(o_ref.dtype)


def _fold_bn_into_conv(w, b, gamma, beta, mean, var, eps=1e-5):
    """Fold eval-mode BatchNorm into the preceding conv's weight/bias."""
    scale = gamma / jnp.sqrt(var + eps)
    return w * scale[:, None, None, None], (b - mean) * scale + beta


def _conv3x3_to_matmul(w):
    """(Co, Ci, 3, 3) -> (Co, 9*Ci); column index = (ky*3 + kx)*Ci + ci."""
    co, ci = w.shape[0], w.shape[1]
    return jnp.transpose(w, (0, 2, 3, 1)).reshape(co, 9 * ci)


def up_block_pallas(x, skip, params):
    """UpBlock forward. x: (N, Cx, h, w), skip: (N, Cs, 2h, 2w), NCHW f32."""
    N, Cx, h, w = x.shape
    Ns, Cs, H, W = skip.shape
    assert Ns == N and H == 2 * h and W == 2 * w
    C_in = Cx + Cs
    HW = H * W

    # ---- host-side parameter prep (trace time only) -------------------------
    w1x1 = params["w_1x1"].reshape(params["w_1x1"].shape[0], C_in)   # (Co, Cin)
    Co = w1x1.shape[0]
    b1x1 = params["b_1x1"].reshape(Co, 1)

    wc1, bc1 = _fold_bn_into_conv(params["conv1_w"], params["conv1_b"],
                                  params["bn1_gamma"], params["bn1_beta"],
                                  params["bn1_mean"], params["bn1_var"])
    wc2, bc2 = _fold_bn_into_conv(params["conv2_w"], params["conv2_b"],
                                  params["bn2_gamma"], params["bn2_beta"],
                                  params["bn2_mean"], params["bn2_var"])
    Cm = wc1.shape[0]
    wc1 = _conv3x3_to_matmul(wc1)            # (Cm, 9*C_in)
    wc2 = _conv3x3_to_matmul(wc2)            # (Co, 9*Cm)
    bc1 = bc1.reshape(Cm, 1)
    bc2 = bc2.reshape(Co, 1)

    # Border masks for the nine 3x3 taps (trace-time constants, 0/1 floats).
    ii = jnp.arange(HW, dtype=jnp.int32)
    row, col = ii // W, ii % W
    masks = []
    for oy in (-1, 0, 1):
        for ox in (-1, 0, 1):
            m = ((row + oy >= 0) & (row + oy < H)
                 & (col + ox >= 0) & (col + ox < W))
            masks.append(m.astype(jnp.float32))
    masks = jnp.stack(masks, axis=0).reshape(9, 1, HW)

    # ---- 2x nearest upsample + channel concat (cheap, stays NCHW) -----------
    x_up = jnp.broadcast_to(x[:, :, :, None, :, None],
                            (N, Cx, h, 2, w, 2)).reshape(N, Cx, H, W)
    act = jnp.concatenate([x_up, skip], axis=1).reshape(N, C_in, HW)

    kernel = functools.partial(_up_block_kernel, H=H, W=W)

    out = pl.pallas_call(
        kernel,
        out_shape=jax.ShapeDtypeStruct((N, Co, HW), jnp.float32),
        grid_spec=pltpu.PrefetchScalarGridSpec(
            num_scalar_prefetch=0,
            grid=(N,),
            in_specs=[
                pl.BlockSpec((1, C_in, HW), lambda b: (b, 0, 0)),
                pl.BlockSpec((9, 1, HW), lambda b: (0, 0, 0)),
                pl.BlockSpec((Co, C_in), lambda b: (0, 0)),
                pl.BlockSpec((Co, 1), lambda b: (0, 0)),
                pl.BlockSpec((Cm, 9 * C_in), lambda b: (0, 0)),
                pl.BlockSpec((Cm, 1), lambda b: (0, 0)),
                pl.BlockSpec((Co, 9 * Cm), lambda b: (0, 0)),
                pl.BlockSpec((Co, 1), lambda b: (0, 0)),
            ],
            out_specs=pl.BlockSpec((1, Co, HW), lambda b: (b, 0, 0)),
        ),
        compiler_params=pltpu.CompilerParams(
            dimension_semantics=("parallel",)),
    )(act, masks, w1x1, b1x1, wc1, bc1, wc2, bc2)

    return out.reshape(N, Co, H, W)


def up_block_reference(x, skip, params, eps=1e-5):
    """Pure-JAX reference (eval-mode BatchNorm), NCHW in/out."""
    N, Cx, h, w = x.shape
    H, W = 2 * h, 2 * w
    x_up = jnp.broadcast_to(x[:, :, :, None, :, None],
                            (N, Cx, h, 2, w, 2)).reshape(N, Cx, H, W)
    xc = jnp.concatenate([x_up, skip], axis=1)

    def conv(z, wt, b, pad):
        out = lax.conv_general_dilated(
            z, wt, window_strides=(1, 1), padding=pad,
            dimension_numbers=("NCHW", "OIHW", "NCHW"))
        return out + b.reshape(1, -1, 1, 1)

    def bn(z, gamma, beta, mean, var):
        inv = (gamma / jnp.sqrt(var + eps)).reshape(1, -1, 1, 1)
        return (z - mean.reshape(1, -1, 1, 1)) * inv + beta.reshape(1, -1, 1, 1)

    res = conv(xc, params["w_1x1"], params["b_1x1"], "VALID")
    hcur = conv(xc, params["conv1_w"], params["conv1_b"], ((1, 1), (1, 1)))
    hcur = jnp.maximum(bn(hcur, params["bn1_gamma"], params["bn1_beta"],
                          params["bn1_mean"], params["bn1_var"]), 0.0)
    hcur = conv(hcur, params["conv2_w"], params["conv2_b"], ((1, 1), (1, 1)))
    hcur = jnp.maximum(bn(hcur, params["bn2_gamma"], params["bn2_beta"],
                          params["bn2_mean"], params["bn2_var"]), 0.0)
    return hcur + res


def make_params(key, c_x, c_skip, c_out, c_inter=None):
    if c_inter is None:
        c_inter = c_out
    c_in = c_x + c_skip
    ks = jax.random.split(key, 14)

    def n(k, shape, s=0.1):
        return s * jax.random.normal(k, shape, jnp.float32)

    return {
        "w_1x1": n(ks[0], (c_out, c_in, 1, 1)),
        "b_1x1": n(ks[1], (c_out,)),
        "conv1_w": n(ks[2], (c_inter, c_in, 3, 3)),
        "conv1_b": n(ks[3], (c_inter,)),
        "bn1_gamma": 1.0 + n(ks[4], (c_inter,)),
        "bn1_beta": n(ks[5], (c_inter,)),
        "bn1_mean": n(ks[6], (c_inter,)),
        "bn1_var": jnp.abs(1.0 + n(ks[7], (c_inter,))),
        "conv2_w": n(ks[8], (c_out, c_inter, 3, 3)),
        "conv2_b": n(ks[9], (c_out,)),
        "bn2_gamma": 1.0 + n(ks[10], (c_out,)),
        "bn2_beta": n(ks[11], (c_out,)),
        "bn2_mean": n(ks[12], (c_out,)),
        "bn2_var": jnp.abs(1.0 + n(ks[13], (c_out,))),
    }


if __name__ == "__main__":
    key = jax.random.PRNGKey(0)
    k_x, k_s, k_p = jax.random.split(key, 3)

    # x: (N, Cx, h, w) is upsampled 2x and concatenated with skip: (N, Cs, 2h, 2w)
    N, Cx, Cs, Co = 2, 4, 4, 8
    h, w = 8, 8
    x = jax.random.normal(k_x, (N, Cx, h, w), jnp.float32)           # NCHW
    skip = jax.random.normal(k_s, (N, Cs, 2 * h, 2 * w), jnp.float32)
    params = make_params(k_p, Cx, Cs, Co)

    out = jax.block_until_ready(up_block_pallas(x, skip, params))
    ref = jax.block_until_ready(up_block_reference(x, skip, params))

    assert out.shape == (N, Co, 2 * h, 2 * w), out.shape
    err = float(jnp.max(jnp.abs(out - ref)))
    assert jnp.allclose(out, ref, atol=2e-4, rtol=2e-4), err

    print("KERNEL_OK")
</pallas_src>

<mosaic_0001>
module attributes {stable_mosaic.version = 11 : i64} {
  func.func @_up_block_kernel(%arg0: i32, %arg1: memref<1x8x256xf32, #tpu.memory_space<vmem>>, %arg2: memref<9x1x256xf32, #tpu.memory_space<vmem>>, %arg3: memref<8x8xf32, #tpu.memory_space<vmem>>, %arg4: memref<8x1xf32, #tpu.memory_space<vmem>>, %arg5: memref<8x72xf32, #tpu.memory_space<vmem>>, %arg6: memref<8x1xf32, #tpu.memory_space<vmem>>, %arg7: memref<8x72xf32, #tpu.memory_space<vmem>>, %arg8: memref<8x1xf32, #tpu.memory_space<vmem>>, %arg9: memref<1x8x256xf32, #tpu.memory_space<vmem>>) attributes {dimension_semantics = [#tpu.dimension_semantics<parallel>], iteration_bounds = array<i64: 2>, scalar_prefetch = 0 : i64, scratch_operands = 0 : i64, tpu.core_type = #tpu.core_type<tc>, window_params = [{transform_indices = @transform_0, window_bounds = array<i64: 1, 8, 256>}, {pipeline_mode = #tpu.pipeline_mode<synchronous>, transform_indices = @transform_1, window_bounds = array<i64: 9, 1, 256>}, {pipeline_mode = #tpu.pipeline_mode<synchronous>, transform_indices = @transform_2, window_bounds = array<i64: 8, 8>}, {pipeline_mode = #tpu.pipeline_mode<synchronous>, transform_indices = @transform_3, window_bounds = array<i64: 8, 1>}, {pipeline_mode = #tpu.pipeline_mode<synchronous>, transform_indices = @transform_4, window_bounds = array<i64: 8, 72>}, {pipeline_mode = #tpu.pipeline_mode<synchronous>, transform_indices = @transform_5, window_bounds = array<i64: 8, 1>}, {pipeline_mode = #tpu.pipeline_mode<synchronous>, transform_indices = @transform_6, window_bounds = array<i64: 8, 72>}, {pipeline_mode = #tpu.pipeline_mode<synchronous>, transform_indices = @transform_7, window_bounds = array<i64: 8, 1>}, {transform_indices = @transform_8, window_bounds = array<i64: 1, 8, 256>}]} {
    %c0 = arith.constant 0 : index
    %c0_0 = arith.constant 0 : index
    %c0_1 = arith.constant 0 : index
    %0 = vector.load %arg1[%c0, %c0_0, %c0_1] : memref<1x8x256xf32, #tpu.memory_space<vmem>>, vector<1x8x256xf32>
    %1 = vector.shape_cast %0 : vector<1x8x256xf32> to vector<8x256xf32>
    %c17_i32 = arith.constant 17 : i32
    %2 = tpu.dynamic_rotate %1 by %c17_i32 dim 1 : vector<8x256xf32>, i32 -> vector<8x256xf32>
    %c0_2 = arith.constant 0 : index
    %c0_3 = arith.constant 0 : index
    %c0_4 = arith.constant 0 : index
    %3 = vector.load %arg2[%c0_2, %c0_3, %c0_4] : memref<9x1x256xf32, #tpu.memory_space<vmem>>, vector<1x1x256xf32>
    %4 = vector.shape_cast %3 : vector<1x1x256xf32> to vector<1x256xf32>
    %5 = vector.broadcast %4 : vector<1x256xf32> to vector<8x256xf32>
    %6 = arith.mulf %2, %5 : vector<8x256xf32>
    %c16_i32 = arith.constant 16 : i32
    %7 = tpu.dynamic_rotate %1 by %c16_i32 dim 1 : vector<8x256xf32>, i32 -> vector<8x256xf32>
    %c1 = arith.constant 1 : index
    %c0_5 = arith.constant 0 : index
    %c0_6 = arith.constant 0 : index
    %8 = vector.load %arg2[%c1, %c0_5, %c0_6] : memref<9x1x256xf32, #tpu.memory_space<vmem>>, vector<1x1x256xf32>
    %9 = vector.shape_cast %8 : vector<1x1x256xf32> to vector<1x256xf32>
    %10 = vector.broadcast %9 : vector<1x256xf32> to vector<8x256xf32>
    %11 = arith.mulf %7, %10 : vector<8x256xf32>
    %c15_i32 = arith.constant 15 : i32
    %12 = tpu.dynamic_rotate %1 by %c15_i32 dim 1 : vector<8x256xf32>, i32 -> vector<8x256xf32>
    %c2 = arith.constant 2 : index
    %c0_7 = arith.constant 0 : index
    %c0_8 = arith.constant 0 : index
    %13 = vector.load %arg2[%c2, %c0_7, %c0_8] : memref<9x1x256xf32, #tpu.memory_space<vmem>>, vector<1x1x256xf32>
    %14 = vector.shape_cast %13 : vector<1x1x256xf32> to vector<1x256xf32>
    %15 = vector.broadcast %14 : vector<1x256xf32> to vector<8x256xf32>
    %16 = arith.mulf %12, %15 : vector<8x256xf32>
    %c1_i32 = arith.constant 1 : i32
    %17 = tpu.dynamic_rotate %1 by %c1_i32 dim 1 : vector<8x256xf32>, i32 -> vector<8x256xf32>
    %c3 = arith.constant 3 : index
    %c0_9 = arith.constant 0 : index
    %c0_10 = arith.constant 0 : index
    %18 = vector.load %arg2[%c3, %c0_9, %c0_10] : memref<9x1x256xf32, #tpu.memory_space<vmem>>, vector<1x1x256xf32>
    %19 = vector.shape_cast %18 : vector<1x1x256xf32> to vector<1x256xf32>
    %20 = vector.broadcast %19 : vector<1x256xf32> to vector<8x256xf32>
    %21 = arith.mulf %17, %20 : vector<8x256xf32>
    %c255_i32 = arith.constant 255 : i32
    %22 = tpu.dynamic_rotate %1 by %c255_i32 dim 1 : vector<8x256xf32>, i32 -> vector<8x256xf32>
    %c5 = arith.constant 5 : index
    %c0_11 = arith.constant 0 : index
    %c0_12 = arith.constant 0 : index
    %23 = vector.load %arg2[%c5, %c0_11, %c0_12] : memref<9x1x256xf32, #tpu.memory_space<vmem>>, vector<1x1x256xf32>
    %24 = vector.shape_cast %23 : vector<1x1x256xf32> to vector<1x256xf32>
    %25 = vector.broadcast %24 : vector<1x256xf32> to vector<8x256xf32>
    %26 = arith.mulf %22, %25 : vector<8x256xf32>
    %c241_i32 = arith.constant 241 : i32
    %27 = tpu.dynamic_rotate %1 by %c241_i32 dim 1 : vector<8x256xf32>, i32 -> vector<8x256xf32>
    %c6 = arith.constant 6 : index
    %c0_13 = arith.constant 0 : index
    %c0_14 = arith.constant 0 : index
    %28 = vector.load %arg2[%c6, %c0_13, %c0_14] : memref<9x1x256xf32, #tpu.memory_space<vmem>>, vector<1x1x256xf32>
    %29 = vector.shape_cast %28 : vector<1x1x256xf32> to vector<1x256xf32>
    %30 = vector.broadcast %29 : vector<1x256xf32> to vector<8x256xf32>
    %31 = arith.mulf %27, %30 : vector<8x256xf32>
    %c240_i32 = arith.constant 240 : i32
    %32 = tpu.dynamic_rotate %1 by %c240_i32 dim 1 : vector<8x256xf32>, i32 -> vector<8x256xf32>
    %c7 = arith.constant 7 : index
    %c0_15 = arith.constant 0 : index
    %c0_16 = arith.constant 0 : index
    %33 = vector.load %arg2[%c7, %c0_15, %c0_16] : memref<9x1x256xf32, #tpu.memory_space<vmem>>, vector<1x1x256xf32>
    %34 = vector.shape_cast %33 : vector<1x1x256xf32> to vector<1x256xf32>
    %35 = vector.broadcast %34 : vector<1x256xf32> to vector<8x256xf32>
    %36 = arith.mulf %32, %35 : vector<8x256xf32>
    %c239_i32 = arith.constant 239 : i32
    %37 = tpu.dynamic_rotate %1 by %c239_i32 dim 1 : vector<8x256xf32>, i32 -> vector<8x256xf32>
    %c8 = arith.constant 8 : index
    %c0_17 = arith.constant 0 : index
    %c0_18 = arith.constant 0 : index
    %38 = vector.load %arg2[%c8, %c0_17, %c0_18] : memref<9x1x256xf32, #tpu.memory_space<vmem>>, vector<1x1x256xf32>
    %39 = vector.shape_cast %38 : vector<1x1x256xf32> to vector<1x256xf32>
    %40 = vector.broadcast %39 : vector<1x256xf32> to vector<8x256xf32>
    %41 = arith.mulf %37, %40 : vector<8x256xf32>
    %42 = tpu.concatenate %6, %11, %16, %21, %1, %26, %31, %36, %41 in 0 : vector<8x256xf32>, vector<8x256xf32>, vector<8x256xf32>, vector<8x256xf32>, vector<8x256xf32>, vector<8x256xf32>, vector<8x256xf32>, vector<8x256xf32>, vector<8x256xf32> -> vector<72x256xf32>
    %c0_19 = arith.constant 0 : index
    %c0_20 = arith.constant 0 : index
    %43 = vector.load %arg5[%c0_19, %c0_20] : memref<8x72xf32, #tpu.memory_space<vmem>>, vector<8x72xf32>
    %cst = arith.constant dense<0.000000e+00> : vector<8x256xf32>
    %44 = tpu.matmul %43, %42, %cst {dimension_numbers = #tpu.dot_dimension_numbers<[1], [0], [0], [1], [0, 0, 1, 1], [], []>} : vector<8x72xf32>, vector<72x256xf32>, vector<8x256xf32> -> vector<8x256xf32>
    %c0_21 = arith.constant 0 : index
    %c0_22 = arith.constant 0 : index
    %45 = vector.load %arg6[%c0_21, %c0_22] : memref<8x1xf32, #tpu.memory_space<vmem>>, vector<8x1xf32>
    %46 = vector.broadcast %45 : vector<8x1xf32> to vector<8x256xf32>
    %47 = arith.addf %44, %46 : vector<8x256xf32>
    %cst_23 = arith.constant 0.000000e+00 : f32
    %48 = vector.broadcast %cst_23 : f32 to vector<8x256xf32>
    %49 = arith.maximumf %47, %48 : vector<8x256xf32>
    %c17_i32_24 = arith.constant 17 : i32
    %50 = tpu.dynamic_rotate %49 by %c17_i32_24 dim 1 : vector<8x256xf32>, i32 -> vector<8x256xf32>
    %c0_25 = arith.constant 0 : index
    %c0_26 = arith.constant 0 : index
    %c0_27 = arith.constant 0 : index
    %51 = vector.load %arg2[%c0_25, %c0_26, %c0_27] : memref<9x1x256xf32, #tpu.memory_space<vmem>>, vector<1x1x256xf32>
    %52 = vector.shape_cast %51 : vector<1x1x256xf32> to vector<1x256xf32>
    %53 = vector.broadcast %52 : vector<1x256xf32> to vector<8x256xf32>
    %54 = arith.mulf %50, %53 : vector<8x256xf32>
    %c16_i32_28 = arith.constant 16 : i32
    %55 = tpu.dynamic_rotate %49 by %c16_i32_28 dim 1 : vector<8x256xf32>, i32 -> vector<8x256xf32>
    %c1_29 = arith.constant 1 : index
    %c0_30 = arith.constant 0 : index
    %c0_31 = arith.constant 0 : index
    %56 = vector.load %arg2[%c1_29, %c0_30, %c0_31] : memref<9x1x256xf32, #tpu.memory_space<vmem>>, vector<1x1x256xf32>
    %57 = vector.shape_cast %56 : vector<1x1x256xf32> to vector<1x256xf32>
    %58 = vector.broadcast %57 : vector<1x256xf32> to vector<8x256xf32>
    %59 = arith.mulf %55, %58 : vector<8x256xf32>
    %c15_i32_32 = arith.constant 15 : i32
    %60 = tpu.dynamic_rotate %49 by %c15_i32_32 dim 1 : vector<8x256xf32>, i32 -> vector<8x256xf32>
    %c2_33 = arith.constant 2 : index
    %c0_34 = arith.constant 0 : index
    %c0_35 = arith.constant 0 : index
    %61 = vector.load %arg2[%c2_33, %c0_34, %c0_35] : memref<9x1x256xf32, #tpu.memory_space<vmem>>, vector<1x1x256xf32>
    %62 = vector.shape_cast %61 : vector<1x1x256xf32> to vector<1x256xf32>
    %63 = vector.broadcast %62 : vector<1x256xf32> to vector<8x256xf32>
    %64 = arith.mulf %60, %63 : vector<8x256xf32>
    %c1_i32_36 = arith.constant 1 : i32
    %65 = tpu.dynamic_rotate %49 by %c1_i32_36 dim 1 : vector<8x256xf32>, i32 -> vector<8x256xf32>
    %c3_37 = arith.constant 3 : index
    %c0_38 = arith.constant 0 : index
    %c0_39 = arith.constant 0 : index
    %66 = vector.load %arg2[%c3_37, %c0_38, %c0_39] : memref<9x1x256xf32, #tpu.memory_space<vmem>>, vector<1x1x256xf32>
    %67 = vector.shape_cast %66 : vector<1x1x256xf32> to vector<1x256xf32>
    %68 = vector.broadcast %67 : vector<1x256xf32> to vector<8x256xf32>
    %69 = arith.mulf %65, %68 : vector<8x256xf32>
    %c255_i32_40 = arith.constant 255 : i32
    %70 = tpu.dynamic_rotate %49 by %c255_i32_40 dim 1 : vector<8x256xf32>, i32 -> vector<8x256xf32>
    %c5_41 = arith.constant 5 : index
    %c0_42 = arith.constant 0 : index
    %c0_43 = arith.constant 0 : index
    %71 = vector.load %arg2[%c5_41, %c0_42, %c0_43] : memref<9x1x256xf32, #tpu.memory_space<vmem>>, vector<1x1x256xf32>
    %72 = vector.shape_cast %71 : vector<1x1x256xf32> to vector<1x256xf32>
    %73 = vector.broadcast %72 : vector<1x256xf32> to vector<8x256xf32>
    %74 = arith.mulf %70, %73 : vector<8x256xf32>
    %c241_i32_44 = arith.constant 241 : i32
    %75 = tpu.dynamic_rotate %49 by %c241_i32_44 dim 1 : vector<8x256xf32>, i32 -> vector<8x256xf32>
    %c6_45 = arith.constant 6 : index
    %c0_46 = arith.constant 0 : index
    %c0_47 = arith.constant 0 : index
    %76 = vector.load %arg2[%c6_45, %c0_46, %c0_47] : memref<9x1x256xf32, #tpu.memory_space<vmem>>, vector<1x1x256xf32>
    %77 = vector.shape_cast %76 : vector<1x1x256xf32> to vector<1x256xf32>
    %78 = vector.broadcast %77 : vector<1x256xf32> to vector<8x256xf32>
    %79 = arith.mulf %75, %78 : vector<8x256xf32>
    %c240_i32_48 = arith.constant 240 : i32
    %80 = tpu.dynamic_rotate %49 by %c240_i32_48 dim 1 : vector<8x256xf32>, i32 -> vector<8x256xf32>
    %c7_49 = arith.constant 7 : index
    %c0_50 = arith.constant 0 : index
    %c0_51 = arith.constant 0 : index
    %81 = vector.load %arg2[%c7_49, %c0_50, %c0_51] : memref<9x1x256xf32, #tpu.memory_space<vmem>>, vector<1x1x256xf32>
    %82 = vector.shape_cast %81 : vector<1x1x256xf32> to vector<1x256xf32>
    %83 = vector.broadcast %82 : vector<1x256xf32> to vector<8x256xf32>
    %84 = arith.mulf %80, %83 : vector<8x256xf32>
    %c239_i32_52 = arith.constant 239 : i32
    %85 = tpu.dynamic_rotate %49 by %c239_i32_52 dim 1 : vector<8x256xf32>, i32 -> vector<8x256xf32>
    %c8_53 = arith.constant 8 : index
    %c0_54 = arith.constant 0 : index
    %c0_55 = arith.constant 0 : index
    %86 = vector.load %arg2[%c8_53, %c0_54, %c0_55] : memref<9x1x256xf32, #tpu.memory_space<vmem>>, vector<1x1x256xf32>
    %87 = vector.shape_cast %86 : vector<1x1x256xf32> to vector<1x256xf32>
    %88 = vector.broadcast %87 : vector<1x256xf32> to vector<8x256xf32>
    %89 = arith.mulf %85, %88 : vector<8x256xf32>
    %90 = tpu.concatenate %54, %59, %64, %69, %49, %74, %79, %84, %89 in 0 : vector<8x256xf32>, vector<8x256xf32>, vector<8x256xf32>, vector<8x256xf32>, vector<8x256xf32>, vector<8x256xf32>, vector<8x256xf32>, vector<8x256xf32>, vector<8x256xf32> -> vector<72x256xf32>
    %c0_56 = arith.constant 0 : index
    %c0_57 = arith.constant 0 : index
    %91 = vector.load %arg7[%c0_56, %c0_57] : memref<8x72xf32, #tpu.memory_space<vmem>>, vector<8x72xf32>
    %cst_58 = arith.constant dense<0.000000e+00> : vector<8x256xf32>
    %92 = tpu.matmul %91, %90, %cst_58 {dimension_numbers = #tpu.dot_dimension_numbers<[1], [0], [0], [1], [0, 0, 1, 1], [], []>} : vector<8x72xf32>, vector<72x256xf32>, vector<8x256xf32> -> vector<8x256xf32>
    %c0_59 = arith.constant 0 : index
    %c0_60 = arith.constant 0 : index
    %93 = vector.load %arg8[%c0_59, %c0_60] : memref<8x1xf32, #tpu.memory_space<vmem>>, vector<8x1xf32>
    %94 = vector.broadcast %93 : vector<8x1xf32> to vector<8x256xf32>
    %95 = arith.addf %92, %94 : vector<8x256xf32>
    %cst_61 = arith.constant 0.000000e+00 : f32
    %96 = vector.broadcast %cst_61 : f32 to vector<8x256xf32>
    %97 = arith.maximumf %95, %96 : vector<8x256xf32>
    %c0_62 = arith.constant 0 : index
    %c0_63 = arith.constant 0 : index
    %98 = vector.load %arg3[%c0_62, %c0_63] : memref<8x8xf32, #tpu.memory_space<vmem>>, vector<8x8xf32>
    %cst_64 = arith.constant dense<0.000000e+00> : vector<8x256xf32>
    %99 = tpu.matmul %98, %1, %cst_64 {dimension_numbers = #tpu.dot_dimension_numbers<[1], [0], [0], [1], [0, 0, 1, 1], [], []>} : vector<8x8xf32>, vector<8x256xf32>, vector<8x256xf32> -> vector<8x256xf32>
    %c0_65 = arith.constant 0 : index
    %c0_66 = arith.constant 0 : index
    %100 = vector.load %arg4[%c0_65, %c0_66] : memref<8x1xf32, #tpu.memory_space<vmem>>, vector<8x1xf32>
    %101 = vector.broadcast %100 : vector<8x1xf32> to vector<8x256xf32>
    %102 = arith.addf %99, %101 : vector<8x256xf32>
    %103 = arith.addf %97, %102 : vector<8x256xf32>
    %c0_67 = arith.constant 0 : index
    %c0_68 = arith.constant 0 : index
    %c0_69 = arith.constant 0 : index
    %104 = vector.load %arg9[%c0_67, %c0_68, %c0_69] : memref<1x8x256xf32, #tpu.memory_space<vmem>>, vector<1x8x256xf32>
    %105 = vector.shape_cast %104 : vector<1x8x256xf32> to vector<8x256xf32>
    %106 = vector.shape_cast %103 : vector<8x256xf32> to vector<1x8x256xf32>
    tpu.vector_store %arg9[%c0_67, %c0_68, %c0_69], %106 {strides = array<i32>} : memref<1x8x256xf32, #tpu.memory_space<vmem>>, vector<1x8x256xf32>,
    return
  }
  func.func @transform_0(%arg0: i32) -> (i32, i32, i32) {
    %c0_i32 = arith.constant 0 : i32
    %c0_i32_0 = arith.constant 0 : i32
    %c0_i32_1 = arith.constant 0 : i32
    return %arg0, %c0_i32, %c0_i32_0 : i32, i32, i32
  }
  func.func @transform_1(%arg0: i32) -> (i32, i32, i32) {
    %c0_i32 = arith.constant 0 : i32
    %c0_i32_0 = arith.constant 0 : i32
    %c0_i32_1 = arith.constant 0 : i32
    %c0_i32_2 = arith.constant 0 : i32
    return %c0_i32, %c0_i32_0, %c0_i32_1 : i32, i32, i32
  }
  func.func @transform_2(%arg0: i32) -> (i32, i32) {
    %c0_i32 = arith.constant 0 : i32
    %c0_i32_0 = arith.constant 0 : i32
    %c0_i32_1 = arith.constant 0 : i32
    return %c0_i32, %c0_i32_0 : i32, i32
  }
  func.func @transform_3(%arg0: i32) -> (i32, i32) {
    %c0_i32 = arith.constant 0 : i32
    %c0_i32_0 = arith.constant 0 : i32
    %c0_i32_1 = arith.constant 0 : i32
    return %c0_i32, %c0_i32_0 : i32, i32
  }
  func.func @transform_4(%arg0: i32) -> (i32, i32) {
    %c0_i32 = arith.constant 0 : i32
    %c0_i32_0 = arith.constant 0 : i32
    %c0_i32_1 = arith.constant 0 : i32
    return %c0_i32, %c0_i32_0 : i32, i32
  }
  func.func @transform_5(%arg0: i32) -> (i32, i32) {
    %c0_i32 = arith.constant 0 : i32
    %c0_i32_0 = arith.constant 0 : i32
    %c0_i32_1 = arith.constant 0 : i32
    return %c0_i32, %c0_i32_0 : i32, i32
  }
  func.func @transform_6(%arg0: i32) -> (i32, i32) {
    %c0_i32 = arith.constant 0 : i32
    %c0_i32_0 = arith.constant 0 : i32
    %c0_i32_1 = arith.constant 0 : i32
    return %c0_i32, %c0_i32_0 : i32, i32
  }
  func.func @transform_7(%arg0: i32) -> (i32, i32) {
    %c0_i32 = arith.constant 0 : i32
    %c0_i32_0 = arith.constant 0 : i32
    %c0_i32_1 = arith.constant 0 : i32
    return %c0_i32, %c0_i32_0 : i32, i32
  }
  func.func @transform_8(%arg0: i32) -> (i32, i32, i32) {
    %c0_i32 = arith.constant 0 : i32
    %c0_i32_0 = arith.constant 0 : i32
    %c0_i32_1 = arith.constant 0 : i32
    return %arg0, %c0_i32, %c0_i32_0 : i32, i32, i32
  }
}

</mosaic_0001>

<bundles_post_ra>
// kernel: tpu_custom_call.1
= control target key start
LH: loop header
LB: loop body
LE: loop exit
PB: predicated region body
PF: predicated region fallthrough
CT: control target
= control target key end

     0   :  { %13 = vsyncpa [#allocation3], 0  ;;  %s1622_s0 = inlined_call_operand.hbm [shape: f32[2,8,256], index: 0, kind: input, shape index: {}]   ;;  %s1623_s1 = inlined_call_operand.vmem [shape: f32[9,1,256], index: 1, kind: input, shape index: {}]   ;;  %s1624_s2 = inlined_call_operand.vmem [shape: f32[8,8], index: 2, kind: input, shape index: {}]   ;;  %s1625_s3 = inlined_call_operand.vmem [shape: f32[8,1], index: 3, kind: input, shape index: {}]   ;;  %s1626_s4 = inlined_call_operand.vmem [shape: f32[8,72], index: 4, kind: input, shape index: {}]   ;;  %s1627_s5 = inlined_call_operand.vmem [shape: f32[8,1], index: 5, kind: input, shape index: {}]   ;;  %s1628_s6 = inlined_call_operand.vmem [shape: f32[8,72], index: 6, kind: input, shape index: {}]   ;;  %s1629_s7 = inlined_call_operand.vmem [shape: f32[8,1], index: 7, kind: input, shape index: {}]   ;;  %s1630_s8 = inlined_call_operand.hbm [shape: f32[2,8,256], index: 8, kind: output, shape index: {}]  }
   0x1   :  { %15 = vsyncpa [#allocation3 + $0x1], 0 }
   0x2   :  { %16 = vsyncpa [#allocation4], 0 }
   0x3   :  { %18 = vsyncpa [#allocation4 + $0x1], 0  ;;  %s1174_s27 = smov 0   ;;  %s1176_s28 = smov 0  }
   0x4   :  { %s1178_s29 = smov 0   ;;  %s1180_s30 = smov 0  }
   0x5 LB: > { %s1195_s9 = sadd.s32 4294967295, %s1115_s30   ;;  %s903_s10 = sadd.s32 4294967294, %s1115_s30   ;;  %s1115_s30 = sphi %s1180_s30, %s1653_s30   ;;  %s1111_s29 = sphi %s1178_s29, %s1652_s29   ;;  %s1107_s28 = sphi %s1176_s28, %s1651_s28   ;;  %s1103_s27 = sphi %s1174_s27, %s1650_s27  }
   0x6   : > { %s1199_s11 = sadd.s32 1, %s1115_s30   ;;  %s31_s12 = sadd.s32 1, %s1111_s29 }
   0x7   : > { %s28_s13 = ssub.s32 %s1115_s30, %s1199_s11  ;;  %p38_p0 = scmp.ne.s32.totalorder %s1111_s29, %s1107_s28 }
   0x8   : > { %p29_p1 = scmp.eq.s32.totalorder %s28_s13, 0  ;;  %p39_p2 = scmp.eq.s32.totalorder %s1115_s30, 0 }
   0x9   : > { %p44_p3 = scmp.ne.s32.totalorder %s1107_s28, %s1103_s27  ;;  %p45_p4 = scmp.eq.s32.totalorder %s1195_s9, 0 }
   0xa   : > { %s1211_s14 = scalar_select %p29_p1, %s1111_s29, %s31_s12  }
   0xb   : > { %p1213_p5 = por %p39_p2, %p38_p0  ;;  %p1217_p6 = por %p45_p4, %p44_p3 }
   0xc   : > { %p215_p7 = scmp.eq.s32.totalorder %s1195_s9, 1  ;;  %p221_p8 = scmp.eq.s32.totalorder %s903_s10, 1 }
   0xd   : > { %p973_p10 = scmp.lt.s32.totalorder %s1115_s30, 2  ;;  %s262_s19 = sand.u32 1, %s1111_s29  }
   0xe   : > { %p1224_p11 = por %p215_p7, %p38_p0  ;;  %p1228_p12 = por %p221_p8, %p44_p3 }
   0xf   : > { %s927_s20 = sshll.u32 %s1115_s30, 8  ;;  %s906_s21 = sshll.u32 %s262_s19, 4 }
  0x10   : > { %s1639_s17 = scalar_select %p1224_p11, 1, 0 }
  0x11   : > { %s1640_s18 = scalar_select %p1228_p12, 1, 0 }
  0x12   : > { %s1237_s24 = scalar_lea.hbm %s1622_s0, %s927_s20  ;;  %s266_s25 = scalar_lea.vmem [#allocation2], %s906_s21 }
  0x13   : > { %s274_s26 = sshll.u32 %s266_s25, 4  ;;  %p1241_p13 = pnand %p973_p10, %p1213_p5  ;;  %s1245_s26 = int_to_ptr.vmem [resolvable:$true] %s274_s26 }
  0x14   : > { %s263_s12 = scalar_lea.sflag [#allocation3], %s262_s19  ;;  %s1019_s13 = scalar_lea.hbm %s1237_s24, 256 }
  0x15   : > { %p1020_p2 = scmp.ne.s32.totalorder %s1237_s24, %s1019_s13  ;;  %p1021_p3 = pneg %p1241_p13 }
  0x16   : > { %s1024_s21 = scalar_lea.hbm %s1622_s0, 512  ;;  %p1025_p5 = scmp.lt.u32.totalorder %s1237_s24, %s1622_s0 }
  0x17   : > { %p1022_p4 = pnand %p1021_p3, %p1020_p2  ;;  %p1026_p8 = scmp.lt.u32.totalorder %s1024_s21, %s1019_s13 }
  0x18   : > { %p1028_p9 = scmp.lt.u32.totalorder %s1019_s13, %s1237_s24 }
  0x19   : > { %p1023_p7 = pneg %p1022_p4  ;;  %p1027_p10 = por %p1026_p8, %p1025_p5 }
  0x1b   : > { %p1029_p0 = por %p1028_p9, %p1027_p10 }
  0x1d   : > { %p1030_p1 = pnand %p1029_p0, %p1023_p7 }
  0x1f   : > { %1033 = shalt.err (!%p1030_p1)
}
  0x20   : > { %s1034_s19 = scalar_lea.vmem %s1245_s26, 256  ;;  %s1117_s25 = smov [#allocation2]  }
  0x21   : > { %p1035_p2 = scmp.ne.s32.totalorder %s1245_s26, %s1034_s19  ;;  %s1039_s15 = sshll.u32 %s1117_s25, 4  ;;  %s1040_s15 = int_to_ptr.vmem [resolvable:$false] %s1039_s15 }
  0x22   : > { %s1041_s20 = scalar_lea.vmem %s1040_s15, 512  ;;  %p1042_p11 = scmp.lt.s32.totalorder %s1245_s26, %s1040_s15 }
  0x23   : > { %p1037_p4 = pnand %p1035_p2, %p1021_p3  ;;  %p1043_p5 = scmp.lt.s32.totalorder %s1041_s20, %s1034_s19 }
  0x25   : > { %p1038_p12 = pneg %p1037_p4  ;;  %p1044_p8 = por %p1043_p5, %p1042_p11 }
  0x27   : > { %p1045_p9 = pnand %p1044_p8, %p1038_p12 }
  0x29   : > { %1048 = shalt.err (!%p1045_p9)
}
  0x2a   : > { %968 = dma.hbm_to_vmem [thread:$0]  (!%p1241_p13), %s1237_s24, 256, %s1245_s26, %s263_s12  }
  0x2b   : > { %p1642_p0 = scmp.lt.s32.totalorder %s1115_s30, 3  ;;  %p1643_p1 = scmp.ge.s32.totalorder %s1115_s30, 1 }
  0x2d   : > { %p280_p3 = pnand %p1643_p1, %p1642_p0 }
  0x2e   : > { %s1279_s13 = sand.u32 (!%p280_p3), 1, %s1107_s28  }
  0x2f   : > { %283 = sbr.rel (%p280_p3) target bundleno = 809 (0x329), region = 52  ;;  %s1632_s21 = sshll.u32 (!%p280_p3), %s1279_s13, 4 }
  0x30   : > { %s286_s22 = scalar_lea.sflag (!%p280_p3), [#allocation3], %s1279_s13  ;;  %s289_s10 = scalar_lea.vmem (!%p280_p3), [#allocation2], %s1632_s21 }
  0x36   : > { %1094 = dma.done.wait (%p1217_p6), %s286_s22, 256  }
  0x37   : > { %1096 = vsyncadd (%p1217_p6), %s286_s22, 4294967040  ;;  %v1289_v0 = vld [vmem:[%s289_s10] sm:$0xff]  ;;  %s1118_s24 = smov 16   ;;  %s1119_s26 = smov 17   ;;  %v1295_v1 = vld [vmem:[%s289_s10 + $0x8] sm:$0xff]  ;;  %v1124_v2 = vmov 0.0   ;;  %v328_v5 = vlaneseq }
  0x38   : > { %347 = vrot.lane.b32.xlu1 %v1289_v0, %s1118_s24  ;;  %324 = vrot.lane.b32.xlu0 %v1289_v0, %s1119_s26  ;;  %s1120_s16 = smov 15   ;;  %s1121_s12 = smov 1   ;;  %v1125_v3 = vmov 0   ;;  %v502_v4 = vld [vmem:[%s1627_s5] sm:$0xff]  ;;  %v915_v38 = vld [vmem:[%s1623_s1 + $0xa] sm:$0x3] }
  0x39   : > { %s1122_s23 = smov 127   ;;  %s1635_s19 = smov 113   ;;  %576 = vmatprep.mubr.f32.mxu0 %v1124_v2  ;;  %723 = vmatprep.mubr.f32.mxu1 %v1124_v2  ;;  %v336_v6 = vshrl.u32 %v328_v5, 7  ;;  %v1330_v7 = vand.u32 127, %v328_v5  ;;  %v912_v10 = vld [vmem:[%s1623_s1 + $0x2] sm:$0x3] }
  0x3a   : > { %1017 = vset.pattern.permute.xlu0 %v1125_v3  ;;  %1018 = vset.pattern.permute.xlu1 %v1125_v3  ;;  %s1633_s25 = smov 112   ;;  %s1127_s15 = smov 111   ;;  %v333_v11 = vld [vmem:[%s1623_s1] sm:$0x3]  ;;  %v913_v28 = vld [vmem:[%s1623_s1 + $0x4] sm:$0x3] }
  0x3b   : > { %v1332_v8 = vsub.s32 0, %v336_v6  ;;  %v1334_v9 = vsub.s32 1, %v336_v6  ;;  %vm351_vm0 = vcmp.lt.s32.totalorder %v1330_v7, 16  ;;  %vm330_vm1 = vcmp.lt.s32.totalorder %v1330_v7, 17  ;;  %v914_v29 = vld [vmem:[%s1623_s1 + $0x6] sm:$0x3] }
  0x3c   : > { %349 = vrot.lane.b32.xlu1 %v1295_v1, %s1118_s24  ;;  %326 = vrot.lane.b32.xlu0 %v1295_v1, %s1119_s26  ;;  %vm373_vm2 = vcmp.lt.s32.totalorder %v1330_v7, 15  ;;  %vm395_vm3 = vcmp.lt.s32.totalorder %v1330_v7, 1  ;;  %vm417_vm4 = vcmp.lt.s32.totalorder %v1330_v7, 127  ;;  %v916_v59 = vld [vmem:[%s1623_s1 + $0xc] sm:$0x3]  ;;  %vm439_vm5 = vcmp.lt.s32.totalorder %v1330_v7, 113 }
  0x3d   : > { %v1345_v14 = vrot.slane %v912_v10, %v1332_v8  ;;  %v1348_v15 = vrot.slane %v333_v11, %v1332_v8  ;;  %v1351_v16 = vrot.slane %v333_v11, %v1334_v9  ;;  %v1354_v17 = vrot.slane %v912_v10, %v1334_v9  ;;  %v917_v60 = vld [vmem:[%s1623_s1 + $0xe] sm:$0x3]  ;;  %v918_v11 = vld [vmem:[%s1623_s1 + $0x10] sm:$0x3]  ;;  %s1645_s20 = smov 112   ;;  %s928_s21 = sshll.u32 %s1195_s9, 8 }
  0x3e   : > { %v1377_v34 = vrot.slane %v913_v28, %v1332_v8  ;;  %v1380_v35 = vrot.slane %v913_v28, %v1334_v9  ;;  %v1383_v36 = vrot.slane %v914_v29, %v1332_v8  ;;  %v1386_v37 = vrot.slane %v914_v29, %v1334_v9  ;;  %s819_s22 = scalar_lea.sflag [#allocation4], %s1279_s13  ;;  %p1647_p11 = scmp.ne.s32.totalorder %s1639_s17, 0 }
  0x3f   : > { %v1401_v45 = vrot.slane %v915_v38, %v1332_v8  ;;  %v1404_v46 = vrot.slane %v915_v38, %v1334_v9  ;;  %v1429_v5 = vrot.slane %v916_v59, %v1334_v9  ;;  %vm461_vm6 = vcmp.lt.s32.totalorder %v1330_v7, 112 }
  0x40   : > { %371 = vrot.lane.b32.xlu1 %v1295_v1, %s1120_s16  ;;  %369 = vrot.lane.b32.xlu0 %v1289_v0, %s1120_s16  ;;  %v1433_v6 = vrot.slane %v917_v60, %v1332_v8  ;;  %v1436_v10 = vrot.slane %v917_v60, %v1334_v9  ;;  %vm483_vm7 = vcmp.lt.s32.totalorder %v1330_v7, 111  ;;  %vm508_vm8 = vcmask 588800  }
  0x41   : > { %vm739_vm9 = vcmask 64512  }
  0x44   : > { %393 = vrot.lane.b32.xlu1 %v1295_v1, %s1121_s12  ;;  %391 = vrot.lane.b32.xlu0 %v1289_v0, %s1121_s12 }
  0x48   : > { %415 = vrot.lane.b32.xlu1 %v1295_v1, %s1122_s23  ;;  %413 = vrot.lane.b32.xlu0 %v1289_v0, %s1122_s23 }
  0x4c   : > { %437 = vrot.lane.b32.xlu1 %v1295_v1, %s1635_s19  ;;  %435 = vrot.lane.b32.xlu0 %v1289_v0, %s1635_s19  ;;  %s1646_s19 = sshll.u32 %s1279_s13, 4 }
  0x50   : > { %459 = vrot.lane.b32.xlu1 %v1295_v1, %s1633_s25  ;;  %457 = vrot.lane.b32.xlu0 %v1289_v0, %s1633_s25  ;;  %s1644_s25 = smov 113  }
  0x54   : > { %481 = vrot.lane.b32.xlu1 %v1295_v1, %s1127_s15  ;;  %479 = vrot.lane.b32.xlu0 %v1289_v0, %s1127_s15 }
  0x58   : > { %505 = vperm.xlu0 %1017, %v502_v4   ;;  %v1426_v4 = vrot.slane %v916_v59, %v1332_v8 }
  0xaa   : > { %v348_v12 = vpop.permute.xlu1 %347  ;;  %v325_v13 = vpop.permute.xlu0 %324 }
  0xae   : > { %v350_v18 = vpop.permute.xlu1 %349  ;;  %v327_v19 = vpop.permute.xlu0 %326 }
  0xaf   : > { %v352_v20 = vsel %vm351_vm0, %v348_v12, %v350_v18  ;;  %v353_v21 = vsel %vm351_vm0, %v350_v18, %v348_v12  ;;  %v331_v22 = vsel %vm330_vm1, %v325_v13, %v327_v19  ;;  %v332_v23 = vsel %vm330_vm1, %v327_v19, %v325_v13 }
  0xb0   : > { %v367_v24 = vmul.f32 %v1345_v14, %v353_v21  ;;  %v345_v25 = vmul.f32 %v1348_v15, %v332_v23  ;;  %v346_v26 = vmul.f32 %v1351_v16, %v331_v22  ;;  %v368_v27 = vmul.f32 %v1354_v17, %v352_v20 }
  0xb1   : > { %v1451_v22 = vrot.slane %v918_v11, %v1334_v9 }
  0xb2   : > { %v372_v30 = vpop.permute.xlu1 %371  ;;  %v370_v31 = vpop.permute.xlu0 %369  ;;  %v929_v32 = vpack.c.bf16 %v368_v27, %v346_v26  ;;  %v931_v33 = vpack.c.bf16 %v367_v24, %v345_v25  ;;  %v1458_v27 = vrot.slane %v918_v11, %v1332_v8  ;;  %v501_v8 = vld [vmem:[%s1626_s4] sm:$0xff] }
  0xb3   : > { %v374_v39 = vsel %vm373_vm2, %v370_v31, %v372_v30  ;;  %v375_v40 = vsel %vm373_vm2, %v372_v30, %v370_v31 }
  0xb4   : > { %930 = vmatprep.subr.bf16.mxu0 %v929_v32  ;;  %v389_v47 = vmul.f32 %v1377_v34, %v375_v40  ;;  %v390_v48 = vmul.f32 %v1380_v35, %v374_v39 }
  0xb5   : > { %932 = vmatpush1.bf16.msra.mxu0 %v931_v33 }
  0xb6   : > { %v394_v41 = vpop.permute.xlu1 %393  ;;  %v392_v42 = vpop.permute.xlu0 %391 }
  0xb7   : > { %v396_v43 = vsel %vm395_vm3, %v392_v42, %v394_v41  ;;  %v397_v44 = vsel %vm395_vm3, %v394_v41, %v392_v42 }
  0xb8   : > { %v411_v49 = vmul.f32 %v1383_v36, %v397_v44  ;;  %v412_v50 = vmul.f32 %v1386_v37, %v396_v43 }
  0xba   : > { %v416_v51 = vpop.permute.xlu1 %415  ;;  %v414_v52 = vpop.permute.xlu0 %413  ;;  %v933_v53 = vpack.c.bf16 %v412_v50, %v390_v48  ;;  %v935_v54 = vpack.c.bf16 %v411_v49, %v389_v47 }
  0xbb   : > { %v418_v55 = vsel %vm417_vm4, %v414_v52, %v416_v51  ;;  %v419_v56 = vsel %vm417_vm4, %v416_v51, %v414_v52 }
  0xbc   : > { %v433_v57 = vmul.f32 %v1401_v45, %v418_v55  ;;  %v434_v58 = vmul.f32 %v1404_v46, %v419_v56  ;;  %934 = vmatprep.subr.bf16.mxu0 %v933_v53 }
  0xbd   : > { %936 = vmatpush1.bf16.msra.mxu0 %v935_v54 }
  0xbe   : > { %v438_v61 = vpop.permute.xlu1 %437  ;;  %v436_v62 = vpop.permute.xlu0 %435  ;;  %v937_v63 = vpack.c.bf16 %v434_v58, %v1295_v1  ;;  %v939_v3 = vpack.c.bf16 %v433_v57, %v1289_v0 }
  0xbf   : > { %v440_v12 = vsel %vm439_vm5, %v436_v62, %v438_v61  ;;  %v441_v13 = vsel %vm439_vm5, %v438_v61, %v436_v62 }
  0xc0   : > { %938 = vmatprep.subr.bf16.mxu0 %v937_v63  ;;  %v455_v23 = vmul.f32 %v1426_v4, %v440_v12  ;;  %v456_v24 = vmul.f32 %v1429_v5, %v441_v13 }
  0xc1   : > { %940 = vmatpush1.bf16.msra.mxu0 %v939_v3 }
  0xc2   : > { %v460_v18 = vpop.permute.xlu1 %459  ;;  %v458_v19 = vpop.permute.xlu0 %457 }
  0xc3   : > { %v462_v20 = vsel %vm461_vm6, %v458_v19, %v460_v18  ;;  %v463_v21 = vsel %vm461_vm6, %v460_v18, %v458_v19 }
  0xc4   : > { %v477_v25 = vmul.f32 %v1433_v6, %v462_v20  ;;  %v478_v26 = vmul.f32 %v1436_v10, %v463_v21 }
  0xc6   : > { %v482_v28 = vpop.permute.xlu1 %481  ;;  %v941_v29 = vpack.c.bf16 %v478_v26, %v456_v24  ;;  %v480_v30 = vpop.permute.xlu0 %479  ;;  %v943_v31 = vpack.c.bf16 %v477_v25, %v455_v23 }
  0xc7   : > { %v484_v32 = vsel %vm483_vm7, %v480_v30, %v482_v28  ;;  %v485_v9 = vsel %vm483_vm7, %v482_v28, %v480_v30 }
  0xc8   : > { %942 = vmatprep.subr.bf16.mxu0 %v941_v29  ;;  %v500_v33 = vmul.f32 %v1451_v22, %v485_v9  ;;  %v499_v38 = vmul.f32 %v1458_v27, %v484_v32 }
  0xc9   : > { %944 = vmatpush1.bf16.msra.mxu0 %v943_v31 }
  0xca   : > { %528 = vmatprep.subr.mxu0 %v500_v33 }
  0xcd   : > { %529 = vmatpush1.msra.mxu0 %v499_v38 }
  0xce   : > { %919 = vmatmul.mubr.msk.f32.vlgmr.msra.gmra.mrb[0].mxu0 %vm508_vm8, %v501_v8  ;;  %743 = vmatprep.subr.mxu0 %v1295_v1  ;;  %v732_v1 = vld [vmem:[%s1624_s2] sm:$0xff] }
  0xcf   : > { %744 = vmatpush1.msra.mxu0 %v1289_v0  ;;  %807 = vmatprep.mubr.f32.mxu0 %v1124_v2  ;;  %v650_v0 = vld [vmem:[%s1629_s7] sm:$0xff] }
  0xd0   : > { %v733_v2 = vld [vmem:[%s1625_s3] sm:$0xff] }
  0xd2   : > { %921 = vmatmul.mubr.msk.f32.vlgmr.msra.gmra.mrb[2].mxu0 %vm739_vm9, %v732_v1 }
  0xd7   : > { %v506_v39 = vpop.permute.xlu0 %505 }
 0x1a1   : > { %v578_v40 = vpop.f32.mrb[0].mxu0 }
 0x1a2   : > { %v579_v41 = vadd.f32 %v578_v40, %v506_v39  ;;  %v580_v42 = vpop.f32.mrb[1].mxu0 }
 0x1a3   : > { %v581_v44 = vadd.f32 %v580_v42, %v506_v39 }
 0x1a4   : > { %v1473_v43 = vmax.f32 %v579_v41, 0.0 }
 0x1a5   : > { %v1479_v47 = vmax.f32 %v581_v44, 0.0 }
 0x1a6   : > { %593 = vrot.lane.b32.xlu0 %v1473_v43, %s1118_s24  ;;  %585 = vrot.lane.b32.xlu1 %v1473_v43, %s1119_s26 }
 0x1aa   : > { %601 = vrot.lane.b32.xlu0 %v1473_v43, %s1120_s16  ;;  %587 = vrot.lane.b32.xlu1 %v1479_v47, %s1119_s26 }
 0x1ae   : > { %609 = vrot.lane.b32.xlu0 %v1473_v43, %s1121_s12  ;;  %595 = vrot.lane.b32.xlu1 %v1479_v47, %s1118_s24 }
 0x1b2   : > { %617 = vrot.lane.b32.xlu0 %v1473_v43, %s1122_s23  ;;  %603 = vrot.lane.b32.xlu1 %v1479_v47, %s1120_s16  ;;  %s1578_s16 = scalar_lea.hbm %s1630_s8, %s928_s21 }
 0x1b6   : > { %625 = vrot.lane.b32.xlu0 %v1473_v43, %s1644_s25  ;;  %611 = vrot.lane.b32.xlu1 %v1479_v47, %s1121_s12  ;;  %s1128_s12 = smov [#allocation5]  }
 0x1ba   : > { %633 = vrot.lane.b32.xlu0 %v1473_v43, %s1645_s20  ;;  %619 = vrot.lane.b32.xlu1 %v1479_v47, %s1122_s23  ;;  %s1053_s23 = sshll.u32 %s1128_s12, 4  ;;  %s1054_s23 = int_to_ptr.vmem [resolvable:$false] %s1053_s23 }
 0x1be   : > { %641 = vrot.lane.b32.xlu0 %v1473_v43, %s1127_s15  ;;  %627 = vrot.lane.b32.xlu1 %v1479_v47, %s1644_s25  ;;  %s321_s25 = scalar_lea.vmem [#allocation5], %s1646_s19 }
 0x1c2   : > { %653 = vperm.xlu0 %1017, %v650_v0   ;;  %635 = vrot.lane.b32.xlu1 %v1479_v47, %s1645_s20  ;;  %s833_s20 = sshll.u32 %s321_s25, 4  ;;  %s1580_s20 = int_to_ptr.vmem [resolvable:$true] %s833_s20 }
 0x1c3   : > { %s1049_s9 = scalar_lea.vmem %s1580_s20, 256  ;;  %p1056_p7 = scmp.lt.s32.totalorder %s1580_s20, %s1054_s23 }
 0x1c4   : > { %p1050_p6 = scmp.ne.s32.totalorder %s1580_s20, %s1049_s9 }
 0x1c6   : > { %643 = vrot.lane.b32.xlu1 %v1479_v47, %s1127_s15  ;;  %p1051_p12 = pnand %p1050_p6, %p1647_p11  ;;  %s1055_s15 = scalar_lea.vmem %s1054_s23, 512 }
 0x1c7   : > { %p1057_p10 = scmp.lt.s32.totalorder %s1055_s15, %s1049_s9 }
 0x1c8   : > { %p1052_p13 = pneg %p1051_p12 }
 0x1c9   : > { %p1058_p2 = por %p1057_p10, %p1056_p7 }
 0x1ca   : > { %736 = vperm.xlu1 %1018, %v733_v2  }
 0x1cb   : > { %p1059_p4 = pnand %p1058_p2, %p1052_p13 }
 0x218   : > { %v594_v48 = vpop.permute.xlu0 %593  ;;  %v586_v49 = vpop.permute.xlu1 %585 }
 0x21c   : > { %v602_v50 = vpop.permute.xlu0 %601  ;;  %v588_v51 = vpop.permute.xlu1 %587 }
 0x21d   : > { %v589_v52 = vsel %vm330_vm1, %v586_v49, %v588_v51  ;;  %v590_v53 = vsel %vm330_vm1, %v588_v51, %v586_v49 }
 0x21e   : > { %v591_v58 = vmul.f32 %v590_v53, %v1348_v15  ;;  %v592_v60 = vmul.f32 %v589_v52, %v1351_v16 }
 0x220   : > { %v610_v54 = vpop.permute.xlu0 %609  ;;  %v596_v55 = vpop.permute.xlu1 %595 }
 0x221   : > { %v597_v56 = vsel %vm351_vm0, %v594_v48, %v596_v55  ;;  %v598_v57 = vsel %vm351_vm0, %v596_v55, %v594_v48 }
 0x222   : > { %v599_v59 = vmul.f32 %v598_v57, %v1345_v14  ;;  %v600_v61 = vmul.f32 %v597_v56, %v1354_v17 }
 0x224   : > { %v604_v62 = vpop.permute.xlu1 %603  ;;  %v945_v63 = vpack.c.bf16 %v600_v61, %v592_v60  ;;  %v947_v3 = vpack.c.bf16 %v599_v59, %v591_v58  ;;  %v618_v11 = vpop.permute.xlu0 %617 }
 0x225   : > { %v605_v12 = vsel %vm373_vm2, %v602_v50, %v604_v62  ;;  %v606_v13 = vsel %vm373_vm2, %v604_v62, %v602_v50 }
 0x226   : > { %946 = vmatprep.subr.bf16.mxu1 %v945_v63  ;;  %v607_v16 = vmul.f32 %v606_v13, %v1377_v34  ;;  %v608_v17 = vmul.f32 %v605_v12, %v1380_v35 }
 0x227   : > { %948 = vmatpush1.bf16.msra.mxu1 %v947_v3 }
 0x228   : > { %v612_v18 = vpop.permute.xlu1 %611  ;;  %v626_v21 = vpop.permute.xlu0 %625 }
 0x229   : > { %v613_v14 = vsel %vm395_vm3, %v610_v54, %v612_v18  ;;  %v614_v15 = vsel %vm395_vm3, %v612_v18, %v610_v54 }
 0x22a   : > { %v615_v19 = vmul.f32 %v614_v15, %v1383_v36  ;;  %v616_v20 = vmul.f32 %v613_v14, %v1386_v37 }
 0x22c   : > { %v620_v23 = vpop.permute.xlu1 %619  ;;  %v949_v24 = vpack.c.bf16 %v616_v20, %v608_v17  ;;  %v951_v25 = vpack.c.bf16 %v615_v19, %v607_v16  ;;  %v634_v30 = vpop.permute.xlu0 %633 }
 0x22d   : > { %v621_v26 = vsel %vm417_vm4, %v618_v11, %v620_v23  ;;  %v622_v28 = vsel %vm417_vm4, %v620_v23, %v618_v11 }
 0x22e   : > { %v623_v29 = vmul.f32 %v621_v26, %v1401_v45  ;;  %v624_v34 = vmul.f32 %v622_v28, %v1404_v46  ;;  %950 = vmatprep.subr.bf16.mxu1 %v949_v24 }
 0x22f   : > { %952 = vmatpush1.bf16.msra.mxu1 %v951_v25 }
 0x230   : > { %v628_v35 = vpop.permute.xlu1 %627  ;;  %v953_v36 = vpack.c.bf16 %v624_v34, %v1479_v47  ;;  %v955_v37 = vpack.c.bf16 %v623_v29, %v1473_v43  ;;  %v642_v40 = vpop.permute.xlu0 %641 }
 0x231   : > { %v629_v31 = vsel %vm439_vm5, %v626_v21, %v628_v35  ;;  %v630_v32 = vsel %vm439_vm5, %v628_v35, %v626_v21 }
 0x232   : > { %954 = vmatprep.subr.bf16.mxu1 %v953_v36  ;;  %v631_v33 = vmul.f32 %v629_v31, %v1426_v4  ;;  %v632_v38 = vmul.f32 %v630_v32, %v1429_v5  ;;  %v649_v5 = vld [vmem:[%s1628_s6] sm:$0xff] }
 0x233   : > { %956 = vmatpush1.bf16.msra.mxu1 %v955_v37 }
 0x234   : > { %v636_v9 = vpop.permute.xlu1 %635 }
 0x235   : > { %v637_v45 = vsel %vm461_vm6, %v634_v30, %v636_v9  ;;  %v638_v46 = vsel %vm461_vm6, %v636_v9, %v634_v30 }
 0x236   : > { %v639_v8 = vmul.f32 %v637_v45, %v1433_v6  ;;  %v640_v39 = vmul.f32 %v638_v46, %v1436_v10  ;;  %v809_v6 = vpop.f32.mrb[2].mxu0 }
 0x237   : > { %v811_v10 = vpop.f32.mrb[3].mxu0 }
 0x238   : > { %v644_v41 = vpop.permute.xlu1 %643  ;;  %v957_v42 = vpack.c.bf16 %v640_v39, %v632_v38  ;;  %v959_v43 = vpack.c.bf16 %v639_v8, %v631_v33 }
 0x239   : > { %v646_v44 = vsel %vm483_vm7, %v644_v41, %v642_v40  ;;  %v645_v47 = vsel %vm483_vm7, %v642_v40, %v644_v41 }
 0x23a   : > { %v648_v0 = vmul.f32 %v646_v44, %v1451_v22  ;;  %958 = vmatprep.subr.bf16.mxu1 %v957_v42  ;;  %v647_v4 = vmul.f32 %v645_v47, %v1458_v27 }
 0x23b   : > { %960 = vmatpush1.bf16.msra.mxu1 %v959_v43 }
 0x23c   : > { %675 = vmatprep.subr.mxu1 %v648_v0 }
 0x23f   : > { %676 = vmatpush1.msra.mxu1 %v647_v4 }
 0x240   : > { %920 = vmatmul.mubr.msk.f32.vlgmr.msra.gmra.mrb[0].mxu1 %vm508_vm8, %v649_v5 }
 0x241   : > { %v654_v1 = vpop.permute.xlu0 %653 }
 0x249   : > { %v737_v7 = vpop.permute.xlu1 %736 }
 0x24a   : > { %v810_v49 = vadd.f32 %v809_v6, %v737_v7  ;;  %v812_v27 = vadd.f32 %v811_v10, %v737_v7 }
 0x313   : > { %v725_v2 = vpop.f32.mrb[0].mxu1 }
 0x314   : > { %v726_v22 = vadd.f32 %v725_v2, %v654_v1  ;;  %v727_v48 = vpop.f32.mrb[1].mxu1 }
 0x315   : > { %v728_v50 = vadd.f32 %v727_v48, %v654_v1 }
 0x316   : > { %v730_v51 = vmax.f32 %v726_v22, 0.0 }
 0x317   : > { %v731_v52 = vmax.f32 %v728_v50, 0.0 }
 0x318   : > { %v814_v53 = vadd.f32 %v810_v49, %v730_v51 }
 0x319   : > { %v815_v54 = vadd.f32 %v812_v27, %v731_v52 }
 0x31a   : > { %816 = vst [vmem:[%s321_s25] sm:$0xff] %v814_v53 }
 0x31b   : > { %817 = vst [vmem:[%s321_s25 + $0x8] sm:$0xff] %v815_v54 }
 0x31c   : > { %1062 = shalt.err (!%p1059_p4)
}
 0x31d   : > { %s1063_s13 = scalar_lea.hbm %s1578_s16, 256  ;;  %s1067_s19 = scalar_lea.hbm %s1630_s8, 512 }
 0x31e   : > { %p1064_p5 = scmp.ne.s32.totalorder %s1578_s16, %s1063_s13  ;;  %p1068_p0 = scmp.lt.u32.totalorder %s1578_s16, %s1630_s8 }
 0x31f   : > { %p1069_p1 = scmp.lt.u32.totalorder %s1067_s19, %s1063_s13  ;;  %p1071_p6 = scmp.lt.u32.totalorder %s1063_s13, %s1578_s16 }
 0x320   : > { %p1065_p8 = pnand %p1064_p5, %p1647_p11 }
 0x321   : > { %p1070_p3 = por %p1069_p1, %p1068_p0 }
 0x322   : > { %p1066_p9 = pneg %p1065_p8 }
 0x323   : > { %p1072_p12 = por %p1071_p6, %p1070_p3 }
 0x325   : > { %p1073_p13 = pnand %p1072_p12, %p1066_p9 }
 0x327   : > { %1076 = shalt.err (!%p1073_p13)
}
 0x328   : > { %963 = dma.vmem_to_hbm [thread:$0]  (%p1647_p11), %s1580_s20, 256, %s1578_s16, %s819_s22  }
 0x329 PF: > { %s845_s26 = sand.u32 1, %s1103_s27   ;;  %p1648_p7 = scmp.ne.s32.totalorder %s1640_s18, 0 }
 0x32a   : > { %p1649_p10 = scmp.ge.s32.totalorder %s1115_s30, 2  ;;  %s846_s9 = scalar_lea.sflag [#allocation4], %s845_s26 }
 0x32c   : > { %p970_p2 = pnand %p1649_p10, %p1648_p7 }
 0x32e   : > { %1098 = dma.done.wait (!%p970_p2), %s846_s9, 256  }
 0x32f   : > { %1100 = vsyncadd (!%p970_p2), %s846_s9, 4294967040  ;;  %p21_p4 = scmp.ge.s32.totalorder %s1199_s11, 4   ;;  %s1650_s27 = smov %s1107_s28 }
 0x330   : > { %s1651_s28 = smov %s1111_s29  ;;  %s1652_s29 = smov %s1211_s14 }
 0x331   : > { %s1653_s30 = smov %s1199_s11  ;;  %23 = sbr.rel (!%p21_p4) target bundleno = 5 (0x5), region = 104 }
 0x338   :  { %851 = vsyncpa [#allocation3], 1 }
 0x339   :  { %853 = vsyncpa [#allocation3 + $0x1], 1 }
 0x33a   :  { %854 = vsyncpa [#allocation4], 1 }
 0x33b   :  { %856 = vsyncpa [#allocation4 + $0x1], 1 }

</bundles_post_ra>
